<compile_context>
chip_gen: v7x
topology: tpu7x:2x2x1
jax: 0.10.0
libtpu: 0.0.40
codegen_flags: <defaults>
</compile_context>

<pallas_src>
import jax
import jax.numpy as jnp
from jax.experimental import pallas as pl
from jax.experimental.pallas import tpu as pltpu

_LANES = 128
_SUBLANES = 8
# 2048 rows x 128 lanes = 1 MiB per f32 input tile. Double-buffered footprint:
# 2 inputs x 2 bufs x 1 MiB + 2 x 1 MiB scratch = ~6 MiB, comfortably inside
# the 32 MiB scoped-VMEM default on v5e/v6e/v7x.
_BLOCK_ROWS = 2048
# Leading "parallel" grid axis so the two TensorCores of a v7x chip each take
# half of the row loop; degenerates to a sequential loop on v5e/v6e.
_SPLITS = 2


def _iou_reduce_kernel(x_ref, y_ref, inter_ref, total_ref, acc_i_ref, acc_t_ref):
    step = pl.program_id(1)

    @pl.when(step == 0)
    def _():
        acc_i_ref[...] = jnp.zeros_like(acc_i_ref)
        acc_t_ref[...] = jnp.zeros_like(acc_t_ref)

    x = x_ref[...].astype(jnp.float32)
    y = y_ref[...].astype(jnp.float32)
    # Pure VPU elementwise accumulation in the steady state.
    acc_i_ref[...] += x * y
    acc_t_ref[...] += x + y

    # Deferred cross-lane reduce + narrow store, once per split.
    @pl.when(step == pl.num_programs(1) - 1)
    def _():
        inter_ref[...] = jnp.sum(acc_i_ref[...]).reshape(1, 1, 1)
        total_ref[...] = jnp.sum(acc_t_ref[...]).reshape(1, 1, 1)


def _pallas_partial_sums(x2, y2, block_rows, splits):
    """x2, y2: (rows, 128) with rows == splits * tiles_per_split * block_rows.

    Returns (sum(x*y), sum(x+y)) as f32 scalars.
    """
    rows = x2.shape[0]
    tiles_per_split = rows // (splits * block_rows)

    def in_map(s, i):
        return (s * tiles_per_split + i, 0)

    inter, total = pl.pallas_call(
        _iou_reduce_kernel,
        out_shape=(
            jax.ShapeDtypeStruct((splits, 1, 1), jnp.float32),
            jax.ShapeDtypeStruct((splits, 1, 1), jnp.float32),
        ),
        grid_spec=pltpu.PrefetchScalarGridSpec(
            num_scalar_prefetch=0,
            grid=(splits, tiles_per_split),
            in_specs=[
                pl.BlockSpec((block_rows, _LANES), in_map),
                pl.BlockSpec((block_rows, _LANES), in_map),
            ],
            out_specs=(
                pl.BlockSpec((1, 1, 1), lambda s, i: (s, 0, 0)),
                pl.BlockSpec((1, 1, 1), lambda s, i: (s, 0, 0)),
            ),
            scratch_shapes=[
                pltpu.VMEM((block_rows, _LANES), jnp.float32),
                pltpu.VMEM((block_rows, _LANES), jnp.float32),
            ],
        ),
        compiler_params=pltpu.CompilerParams(
            dimension_semantics=("parallel", "arbitrary"),
        ),
    )(x2, y2)

    return jnp.sum(inter), jnp.sum(total)


def iou_score(inputs, targets, smooth=1.0):
    """Mirrors IoUScore.forward: flatten, sum(x*y), sum(x+y), scalar IoU."""
    x = jnp.ravel(inputs)
    y = jnp.ravel(targets)
    # Keep narrow dtypes (bf16/int8) as-is in HBM; cast to f32 inside the
    # kernel. Bools are promoted here for layout simplicity.
    if x.dtype == jnp.bool_:
        x = x.astype(jnp.float32)
    if y.dtype == jnp.bool_:
        y = y.astype(jnp.float32)
    n = x.shape[0]

    inter = jnp.float32(0.0)
    total = jnp.float32(0.0)

    # Bulk of the data: large aligned blocks, no padding, no extra copies.
    chunk = _SPLITS * _BLOCK_ROWS * _LANES
    n_main = (n // chunk) * chunk
    if n_main > 0:
        xm = x[:n_main].reshape(-1, _LANES)
        ym = y[:n_main].reshape(-1, _LANES)
        i_m, t_m = _pallas_partial_sums(xm, ym, _BLOCK_ROWS, _SPLITS)
        inter = inter + i_m
        total = total + t_m

    # Ragged tail (< _SPLITS * _BLOCK_ROWS * 128 elements): pad only this small
    # remainder to an (8,128) multiple and reduce it as a single block.
    # Zero padding does not change either reduction.
    n_tail = n - n_main
    if n_tail > 0:
        xt = x[n_main:]
        yt = y[n_main:]
        pad = (-n_tail) % (_SUBLANES * _LANES)
        if pad:
            xt = jnp.pad(xt, (0, pad))
            yt = jnp.pad(yt, (0, pad))
        tail_rows = (n_tail + pad) // _LANES
        i_t, t_t = _pallas_partial_sums(
            xt.reshape(tail_rows, _LANES),
            yt.reshape(tail_rows, _LANES),
            block_rows=tail_rows,
            splits=1,
        )
        inter = inter + i_t
        total = total + t_t

    union = total - inter
    # TODO(synk): original module calls .cpu().numpy(); we return a JAX scalar.
    return (inter + jnp.float32(smooth)) / (union + jnp.float32(smooth))


if __name__ == "__main__":
    key = jax.random.PRNGKey(0)
    k1, k2 = jax.random.split(key)
    # small shapes consistent with a segmentation-mask use case: [2, 4, 16, 16]
    inputs = jax.random.uniform(k1, (2, 4, 16, 16), dtype=jnp.float32)
    targets = (jax.random.uniform(k2, (2, 4, 16, 16)) > 0.5).astype(jnp.float32)

    iou = iou_score(inputs, targets, smooth=1.0)
    jax.block_until_ready(iou)

    # reference check in plain JAX
    xi = inputs.reshape(-1)
    ti = targets.reshape(-1)
    inter_ref = jnp.sum(xi * ti)
    total_ref = jnp.sum(xi + ti)
    iou_ref = (inter_ref + 1.0) / (total_ref - inter_ref + 1.0)
    assert jnp.allclose(iou, iou_ref, rtol=1e-5, atol=1e-6), (iou, iou_ref)

    print("KERNEL_OK")
</pallas_src>

<mosaic_0001>
module attributes {stable_mosaic.version = 11 : i64} {
  func.func @_iou_reduce_kernel(%arg0: i32, %arg1: i32, %arg2: memref<16x128xf32, #tpu.memory_space<vmem>>, %arg3: memref<16x128xf32, #tpu.memory_space<vmem>>, %arg4: memref<1x1x1xf32, #tpu.memory_space<vmem>>, %arg5: memref<1x1x1xf32, #tpu.memory_space<vmem>>, %arg6: memref<16x128xf32, #tpu.memory_space<vmem>>, %arg7: memref<16x128xf32, #tpu.memory_space<vmem>>) attributes {dimension_semantics = [#tpu.dimension_semantics<parallel>, #tpu.dimension_semantics<arbitrary>], iteration_bounds = array<i64: 1, 1>, scalar_prefetch = 0 : i64, scratch_operands = 2 : i64, tpu.core_type = #tpu.core_type<tc>, window_params = [{transform_indices = @transform_0, window_bounds = array<i64: 16, 128>}, {transform_indices = @transform_1, window_bounds = array<i64: 16, 128>}, {transform_indices = @transform_2, window_bounds = array<i64: 1, 1, 1>}, {transform_indices = @transform_3, window_bounds = array<i64: 1, 1, 1>}]} {
    %c0_i32 = arith.constant 0 : i32
    %0 = arith.cmpi eq, %arg1, %c0_i32 : i32
    %1 = arith.extui %0 : i1 to i32
    %c0_i32_0 = arith.constant 0 : i32
    %2 = arith.cmpi ne, %1, %c0_i32_0 : i32
    scf.if %2 {
      %cst = arith.constant 0.000000e+00 : f32
      %16 = vector.broadcast %cst : f32 to vector<16x128xf32>
      %c0_14 = arith.constant 0 : index
      %c0_15 = arith.constant 0 : index
      %17 = vector.load %arg6[%c0_14, %c0_15] : memref<16x128xf32, #tpu.memory_space<vmem>>, vector<16x128xf32>
      tpu.vector_store %arg6[%c0_14, %c0_15], %16 {strides = array<i32>} : memref<16x128xf32, #tpu.memory_space<vmem>>, vector<16x128xf32>,
      %cst_16 = arith.constant 0.000000e+00 : f32
      %18 = vector.broadcast %cst_16 : f32 to vector<16x128xf32>
      %c0_17 = arith.constant 0 : index
      %c0_18 = arith.constant 0 : index
      %19 = vector.load %arg7[%c0_17, %c0_18] : memref<16x128xf32, #tpu.memory_space<vmem>>, vector<16x128xf32>
      tpu.vector_store %arg7[%c0_17, %c0_18], %18 {strides = array<i32>} : memref<16x128xf32, #tpu.memory_space<vmem>>, vector<16x128xf32>,
    } else {
    }
    %c0 = arith.constant 0 : index
    %c0_1 = arith.constant 0 : index
    %3 = vector.load %arg2[%c0, %c0_1] : memref<16x128xf32, #tpu.memory_space<vmem>>, vector<16x128xf32>
    %c0_2 = arith.constant 0 : index
    %c0_3 = arith.constant 0 : index
    %4 = vector.load %arg3[%c0_2, %c0_3] : memref<16x128xf32, #tpu.memory_space<vmem>>, vector<16x128xf32>
    %c0_4 = arith.constant 0 : index
    %c0_5 = arith.constant 0 : index
    %5 = vector.load %arg6[%c0_4, %c0_5] : memref<16x128xf32, #tpu.memory_space<vmem>>, vector<16x128xf32>
    %6 = arith.mulf %3, %4 : vector<16x128xf32>
    %7 = arith.addf %5, %6 : vector<16x128xf32>
    %c0_6 = arith.constant 0 : index
    %c0_7 = arith.constant 0 : index
    %8 = vector.load %arg6[%c0_6, %c0_7] : memref<16x128xf32, #tpu.memory_space<vmem>>, vector<16x128xf32>
    tpu.vector_store %arg6[%c0_6, %c0_7], %7 {strides = array<i32>} : memref<16x128xf32, #tpu.memory_space<vmem>>, vector<16x128xf32>,
    %c0_8 = arith.constant 0 : index
    %c0_9 = arith.constant 0 : index
    %9 = vector.load %arg7[%c0_8, %c0_9] : memref<16x128xf32, #tpu.memory_space<vmem>>, vector<16x128xf32>
    %10 = arith.addf %3, %4 : vector<16x128xf32>
    %11 = arith.addf %9, %10 : vector<16x128xf32>
    %c0_10 = arith.constant 0 : index
    %c0_11 = arith.constant 0 : index
    %12 = vector.load %arg7[%c0_10, %c0_11] : memref<16x128xf32, #tpu.memory_space<vmem>>, vector<16x128xf32>
    tpu.vector_store %arg7[%c0_10, %c0_11], %11 {strides = array<i32>} : memref<16x128xf32, #tpu.memory_space<vmem>>, vector<16x128xf32>,
    %c0_i32_12 = arith.constant 0 : i32
    %13 = arith.cmpi eq, %arg1, %c0_i32_12 : i32
    %14 = arith.extui %13 : i1 to i32
    %c0_i32_13 = arith.constant 0 : i32
    %15 = arith.cmpi ne, %14, %c0_i32_13 : i32
    scf.if %15 {
      %c0_14 = arith.constant 0 : index
      %c0_15 = arith.constant 0 : index
      %16 = vector.load %arg6[%c0_14, %c0_15] : memref<16x128xf32, #tpu.memory_space<vmem>>, vector<16x128xf32>
      %17 = vector.shape_cast %16 : vector<16x128xf32> to vector<1x16x128xf32>
      %cst = arith.constant dense<0.000000e+00> : vector<1xf32>
      %18 = vector.multi_reduction <add>, %17, %cst [1, 2] : vector<1x16x128xf32> to vector<1xf32>
      %19 = vector.shape_cast %18 : vector<1xf32> to vector<1x1x1xf32>
      %20 = vector.extract %19[0, 0, 0] : f32 from vector<1x1x1xf32>
      %21 = vector.broadcast %20 : f32 to vector<1x1x1xf32>
      %c0_16 = arith.constant 0 : index
      %c0_17 = arith.constant 0 : index
      %c0_18 = arith.constant 0 : index
      %22 = vector.load %arg4[%c0_16, %c0_17, %c0_18] : memref<1x1x1xf32, #tpu.memory_space<vmem>>, vector<1x1x1xf32>
      tpu.vector_store %arg4[%c0_16, %c0_17, %c0_18], %21 {strides = array<i32>} : memref<1x1x1xf32, #tpu.memory_space<vmem>>, vector<1x1x1xf32>,
      %c0_19 = arith.constant 0 : index
      %c0_20 = arith.constant 0 : index
      %23 = vector.load %arg7[%c0_19, %c0_20] : memref<16x128xf32, #tpu.memory_space<vmem>>, vector<16x128xf32>
      %24 = vector.shape_cast %23 : vector<16x128xf32> to vector<1x16x128xf32>
      %cst_21 = arith.constant dense<0.000000e+00> : vector<1xf32>
      %25 = vector.multi_reduction <add>, %24, %cst_21 [1, 2] : vector<1x16x128xf32> to vector<1xf32>
      %26 = vector.shape_cast %25 : vector<1xf32> to vector<1x1x1xf32>
      %27 = vector.extract %26[0, 0, 0] : f32 from vector<1x1x1xf32>
      %28 = vector.broadcast %27 : f32 to vector<1x1x1xf32>
      %c0_22 = arith.constant 0 : index
      %c0_23 = arith.constant 0 : index
      %c0_24 = arith.constant 0 : index
      %29 = vector.load %arg5[%c0_22, %c0_23, %c0_24] : memref<1x1x1xf32, #tpu.memory_space<vmem>>, vector<1x1x1xf32>
      tpu.vector_store %arg5[%c0_22, %c0_23, %c0_24], %28 {strides = array<i32>} : memref<1x1x1xf32, #tpu.memory_space<vmem>>, vector<1x1x1xf32>,
    } else {
    }
    return
  }
  func.func @transform_0(%arg0: i32, %arg1: i32) -> (i32, i32) {
    %c1_i32 = arith.constant 1 : i32
    %0 = arith.muli %arg0, %c1_i32 : i32
    %1 = arith.addi %0, %arg1 : i32
    %c0_i32 = arith.constant 0 : i32
    %c0_i32_0 = arith.constant 0 : i32
    return %1, %c0_i32 : i32, i32
  }
  func.func @transform_1(%arg0: i32, %arg1: i32) -> (i32, i32) {
    %c1_i32 = arith.constant 1 : i32
    %0 = arith.muli %arg0, %c1_i32 : i32
    %1 = arith.addi %0, %arg1 : i32
    %c0_i32 = arith.constant 0 : i32
    %c0_i32_0 = arith.constant 0 : i32
    return %1, %c0_i32 : i32, i32
  }
  func.func @transform_2(%arg0: i32, %arg1: i32) -> (i32, i32, i32) {
    %c0_i32 = arith.constant 0 : i32
    %c0_i32_0 = arith.constant 0 : i32
    %c0_i32_1 = arith.constant 0 : i32
    return %arg0, %c0_i32, %c0_i32_0 : i32, i32, i32
  }
  func.func @transform_3(%arg0: i32, %arg1: i32) -> (i32, i32, i32) {
    %c0_i32 = arith.constant 0 : i32
    %c0_i32_0 = arith.constant 0 : i32
    %c0_i32_1 = arith.constant 0 : i32
    return %arg0, %c0_i32, %c0_i32_0 : i32, i32, i32
  }
}

</mosaic_0001>

<bundles_post_ra>
// kernel: tpu_custom_call.1
= control target key start
LH: loop header
LB: loop body
LE: loop exit
PB: predicated region body
PF: predicated region fallthrough
CT: control target
= control target key end

     0   :  { %9 = vsyncpa [#allocation5], 0  ;;  %s327_s0 = inlined_call_operand.hbm [shape: f32[16,128], index: 0, kind: input, shape index: {}]   ;;  %s328_s1 = inlined_call_operand.hbm [shape: f32[16,128], index: 1, kind: input, shape index: {}]   ;;  %s329_s2 = inlined_call_operand.hbm [shape: f32[1,1,1], index: 2, kind: output, shape index: {0}]   ;;  %s330_s3 = inlined_call_operand.hbm [shape: f32[1,1,1], index: 3, kind: output, shape index: {1}]  }
   0x1   :  { %10 = vsyncpa [#allocation8], 0 }
   0x2   :  { %11 = vsyncpa [#allocation6], 0 }
   0x3   :  { %12 = vsyncpa [#allocation11], 0  ;;  %s251_s12 = smov [#allocation4]   ;;  %s155_s16 = scalar_lea.hbm %s327_s0, 256 }
   0x4   :  { %s22_s13 = sshll.u32 %s251_s12, 4  ;;  %p156_p0 = scmp.ne.s32.totalorder %s327_s0, %s155_s16  ;;  %s23_s13 = int_to_ptr.vmem [resolvable:$true] %s22_s13 }
   0x5   :  { %p159_p1 = scmp.lt.u32.totalorder %s155_s16, %s327_s0 }
   0x7   :  { %p161_p2 = pnand %p159_p1, %p156_p0 }
   0x9   :  { %164 = shalt.err (!%p161_p2)
}
   0xa   :  { %s165_s21 = scalar_lea.vmem %s23_s13, 256  ;;  %p170_p4 = scmp.lt.s32.totalorder %s23_s13, %s23_s13 }
   0xb   :  { %p166_p3 = scmp.ne.s32.totalorder %s23_s13, %s165_s21  ;;  %p171_p5 = scmp.lt.s32.totalorder %s165_s21, %s165_s21 }
   0xd   :  { %p172_p6 = por %p171_p5, %p170_p4 }
   0xf   :  { %p173_p7 = pnand %p172_p6, %p166_p3 }
  0x11   :  { %176 = shalt.err (!%p173_p7)
}
  0x12   :  { %s252_s22 = smov 128   ;;  %s253_s23 = smov 8  }
  0x13   :  { %28 = dma.hbm_to_vmem [thread:$0]  %s327_s0, 256, %s23_s13, [#allocation5], %s252_s22, %s252_s22, %s253_s23  }
  0x14   :  { %s254_s26 = smov [#allocation7]   ;;  %s177_s30 = scalar_lea.hbm %s328_s1, 256 }
  0x15   :  { %s38_s27 = sshll.u32 %s254_s26, 4  ;;  %p178_p8 = scmp.ne.s32.totalorder %s328_s1, %s177_s30  ;;  %s39_s27 = int_to_ptr.vmem [resolvable:$true] %s38_s27 }
  0x16   :  { %p181_p9 = scmp.lt.u32.totalorder %s177_s30, %s328_s1 }
  0x18   :  { %p183_p10 = pnand %p181_p9, %p178_p8 }
  0x1a   :  { %186 = shalt.err (!%p183_p10)
}
  0x1b   :  { %s187_s8 = scalar_lea.vmem %s39_s27, 256  ;;  %p192_p12 = scmp.lt.s32.totalorder %s39_s27, %s39_s27 }
  0x1c   :  { %p188_p11 = scmp.ne.s32.totalorder %s39_s27, %s187_s8  ;;  %p193_p13 = scmp.lt.s32.totalorder %s187_s8, %s187_s8 }
  0x1e   :  { %p194_p0 = por %p193_p13, %p192_p12 }
  0x20   :  { %p195_p1 = pnand %p194_p0, %p188_p11 }
  0x22   :  { %198 = shalt.err (!%p195_p1)
}
  0x23   :  { %44 = dma.hbm_to_vmem [thread:$0]  %s328_s1, 256, %s39_s27, [#allocation8], %s252_s22, %s252_s22, %s253_s23  }
  0x24   :  { %243 = dma.done.wait [#allocation5], 256  }
  0x25   :  { %244 = vsyncadd [#allocation5], 4294967040 }
  0x26   :  { %245 = dma.done.wait [#allocation8], 256  }
  0x27   :  { %246 = vsyncadd [#allocation8], 4294967040  ;;  %v63_v0 = vld [vmem:[#allocation4] sm:$0xff]  ;;  %v64_v1 = vld [vmem:[#allocation4 + $0x8] sm:$0xff]  ;;  %s255_s1 = smov [#allocation9]   ;;  %vm99_vm0 = vcmask 0  }
  0x28   :  { %v65_v2 = vld [vmem:[#allocation7] sm:$0xff]  ;;  %v66_v3 = vld [vmem:[#allocation7 + $0x8] sm:$0xff]  ;;  %s121_s10 = sshll.u32 %s255_s1, 4  ;;  %s256_s12 = smov [#allocation10]   ;;  %s122_s10 = int_to_ptr.vmem [resolvable:$true] %s121_s10 }
  0x29   :  { %v69_v4 = vmul.f32 %v65_v2, %v63_v0  ;;  %v70_v5 = vmul.f32 %v66_v3, %v64_v1  ;;  %v77_v6 = vadd.f32 %v65_v2, %v63_v0  ;;  %v78_v7 = vadd.f32 %v66_v3, %v64_v1  ;;  %s131_s13 = sshll.u32 %s256_s12, 4  ;;  %s199_s14 = scalar_lea.vmem %s122_s10, 16  ;;  %s132_s13 = int_to_ptr.vmem [resolvable:$true] %s131_s13 }
  0x2a   :  { %p200_p2 = scmp.ne.s32.totalorder %s122_s10, %s199_s14  ;;  %s203_s15 = scalar_lea.vmem %s122_s10, 32 }
  0x2b   :  { %v88_v8 = vadd.f32 %v70_v5, %v69_v4  ;;  %v103_v9 = vadd.f32 %v78_v7, %v77_v6  ;;  %p204_p3 = scmp.lt.s32.totalorder %s122_s10, %s122_s10  ;;  %p205_p4 = scmp.lt.s32.totalorder %s203_s15, %s199_s14 }
  0x2d   :  { %89 = vadd.xlane.f32.xlu0 %v88_v8  ;;  %p206_p5 = por %p205_p4, %p204_p3 }
  0x2f   :  { %p207_p6 = pnand %p206_p5, %p200_p2 }
  0x31   :  { %104 = vadd.xlane.f32.xlu0 %v103_v9 }
  0xba   :  { %v90_v10 = vpop.xlane.xlu0 %89 }
  0xbb   :  { %v91_v11 = vrot.slane %v90_v10, 4 }
  0xbd   :  { %v92_v12 = vadd.f32 %v91_v11, %v90_v10 }
  0xbe   :  { %v105_v13 = vpop.xlane.xlu0 %104 }
  0xbf   :  { %v93_v14 = vrot.slane %v92_v12, 2  ;;  %v106_v15 = vrot.slane %v105_v13, 4 }
  0xc1   :  { %v107_v16 = vadd.f32 %v106_v15, %v105_v13  ;;  %v94_v17 = vadd.f32 %v93_v14, %v92_v12 }
  0xc3   :  { %v108_v18 = vrot.slane %v107_v16, 2  ;;  %v95_v19 = vrot.slane %v94_v17, 1 }
  0xc5   :  { %v109_v20 = vadd.f32 %v108_v18, %v107_v16  ;;  %v96_v21 = vadd.f32 %v95_v19, %v94_v17 }
  0xc7   :  { %145 = vpush %v96_v21  ;;  %v110_v22 = vrot.slane %v109_v20, 1 }
  0xc9   :  { %v111_v23 = vadd.f32 %v110_v22, %v109_v20 }
  0xcb   :  { %147 = vpush %v111_v23 }
  0xf8   :  { %s146_s11 = spop %145 }
  0xf9   :  { %v98_v24 = vstv %s146_s11 }
  0xfa   :  { %100 = vst.msk [vmem:[#allocation9] sm:$0x1] %vm99_vm0, %v98_v24 }
  0xfb   :  { %210 = shalt.err (!%p207_p6)
}
  0xfc   :  { %s211_s18 = scalar_lea.hbm %s329_s2, 16 }
  0xfd   :  { %p212_p7 = scmp.ne.s32.totalorder %s329_s2, %s211_s18  ;;  %p215_p8 = scmp.lt.u32.totalorder %s211_s18, %s329_s2 }
  0xff   :  { %p217_p9 = pnand %p215_p8, %p212_p7 }
 0x101   :  { %220 = shalt.err (!%p217_p9)
}
 0x102   :  { %124 = dma.vmem_to_hbm [thread:$0]  %s122_s10, 16, %s329_s2, [#allocation6]  }
 0x103   :  { %s148_s25 = spop %147  ;;  %s221_s26 = scalar_lea.vmem %s132_s13, 16 }
 0x104   :  { %v113_v25 = vstv %s148_s25  ;;  %p222_p10 = scmp.ne.s32.totalorder %s132_s13, %s221_s26  ;;  %s225_s27 = scalar_lea.vmem %s132_s13, 32 }
 0x105   :  { %114 = vst.msk [vmem:[#allocation10] sm:$0x1] %vm99_vm0, %v113_v25  ;;  %p226_p11 = scmp.lt.s32.totalorder %s132_s13, %s132_s13  ;;  %p227_p12 = scmp.lt.s32.totalorder %s225_s27, %s221_s26 }
 0x107   :  { %p228_p13 = por %p227_p12, %p226_p11 }
 0x109   :  { %p229_p0 = pnand %p228_p13, %p222_p10 }
 0x10b   :  { %232 = shalt.err (!%p229_p0)
}
 0x10c   :  { %s233_s30 = scalar_lea.hbm %s330_s3, 16 }
 0x10d   :  { %p234_p1 = scmp.ne.s32.totalorder %s330_s3, %s233_s30  ;;  %p237_p2 = scmp.lt.u32.totalorder %s233_s30, %s330_s3 }
 0x10f   :  { %p239_p3 = pnand %p237_p2, %p234_p1 }
 0x111   :  { %242 = shalt.err (!%p239_p3)
}
 0x112   :  { %134 = dma.vmem_to_hbm [thread:$0]  %s132_s13, 16, %s330_s3, [#allocation11]  }
 0x113   :  { %247 = dma.done.wait [#allocation6], 16  }
 0x114   :  { %248 = vsyncadd [#allocation6], 4294967280 }
 0x115   :  { %249 = dma.done.wait [#allocation11], 16  }
 0x116   :  { %250 = vsyncadd [#allocation11], 4294967280 }
 0x117   :  { %141 = vsyncpa [#allocation5], 1 }
 0x118   :  { %142 = vsyncpa [#allocation8], 1 }
 0x119   :  { %143 = vsyncpa [#allocation6], 1 }
 0x11a   :  { %144 = vsyncpa [#allocation11], 1 }

</bundles_post_ra>
